<compile_context>
chip_gen: v7x
topology: tpu7x:2x2x1
jax: 0.10.0
libtpu: 0.0.40
codegen_flags: <defaults>
</compile_context>

<pallas_src>
import functools

import jax
import jax.numpy as jnp
from jax.experimental import pallas as pl
from jax.experimental.pallas import tpu as pltpu

GAMMA = 1.5
ALPHA = 0.25
LANES = 128


def _focal_kernel(pred_ref, true_ref, out_ref, *, gamma, alpha):
    i = pl.program_id(1)  # reduction ("arbitrary") axis

    @pl.when(i == 0)
    def _():
        out_ref[...] = jnp.zeros_like(out_ref)

    x = pred_ref[...].astype(jnp.float32)
    y = true_ref[...].astype(jnp.float32)

    # Shared exponential: e = exp(-|x|) feeds both the numerically stable
    # BCE-with-logits term and the sigmoid (one exp instead of two).
    e = jnp.exp(-jnp.abs(x))

    # BCEWithLogitsLoss(reduction='none'): max(x,0) - x*y + log(1 + exp(-|x|))
    bce = jnp.maximum(x, 0.0) - x * y + jnp.log1p(e)

    # sigmoid(x) = 1/(1+e) for x >= 0, e/(1+e) for x < 0  (e = exp(-|x|))
    inv_1pe = 1.0 / (1.0 + e)
    pred_prob = jnp.where(x >= 0.0, inv_1pe, e * inv_1pe)

    p_t = y * pred_prob + (1.0 - y) * (1.0 - pred_prob)
    alpha_factor = y * alpha + (1.0 - y) * (1.0 - alpha)

    # Clamp so rounding (p_t marginally > 1) can never produce NaN.
    t = jnp.maximum(1.0 - p_t, 0.0)
    if gamma == 1.5:                      # static trace-time specialization
        modulating_factor = t * jnp.sqrt(t)   # 1 EUP op instead of log+exp
    elif gamma == 2.0:
        modulating_factor = t * t
    else:
        modulating_factor = t ** gamma

    loss = bce * alpha_factor * modulating_factor      # (tr, 128)

    tr = loss.shape[0]
    if tr % 8 == 0:
        # Reshape keeps the (8,128) minor tile intact, so the axis-1 sum is
        # pure VPU vreg adds; acc stays a 1024-slot vector (better numerics).
        out_ref[...] += loss.reshape(1, tr // 8, 8, LANES).sum(axis=1)
    else:
        # Fallback (rows not sublane-aligned -> single grid step): one full
        # reduce, parked in slot (0,0,0) of the accumulator block via a mask.
        s = jnp.sum(loss)
        row_ids = jax.lax.broadcasted_iota(jnp.int32, (1, 8, LANES), 1)
        lane_ids = jax.lax.broadcasted_iota(jnp.int32, (1, 8, LANES), 2)
        out_ref[...] += jnp.where((row_ids == 0) & (lane_ids == 0), s, 0.0)


def _pick_tiling(rows, max_rows_per_tile=1024):
    """Choose (ncores, tile_rows, inner_steps) for the (rows, 128) slab."""
    ncores = 2 if (rows % 2 == 0 and (rows // 2) % 8 == 0) else 1
    per_core = rows // ncores
    if per_core % 8 != 0:
        # Block must equal the full dim when not sublane-aligned.
        return 1, rows, 1
    cap = min(max_rows_per_tile, per_core)
    cap -= cap % 8
    tr = 8
    for cand in range(cap, 7, -8):
        if per_core % cand == 0:
            tr = cand
            break
    return ncores, tr, per_core // tr


def focal_loss(pred, true, *, gamma=GAMMA, alpha=ALPHA, reduction="mean",
               max_rows_per_tile=1024):
    """pred/true: same-shape float arrays (e.g. NCHW). Returns scalar f32."""
    assert pred.shape == true.shape
    total_n = pred.size
    assert total_n % LANES == 0, "element count must flatten to (rows, 128)"
    rows = total_n // LANES

    # No dtype forcing: bf16 inputs pass through at half the HBM traffic.
    pred2d = pred.reshape(rows, LANES)
    true2d = true.reshape(rows, LANES)

    ncores, tr, inner = _pick_tiling(rows, max_rows_per_tile)

    kernel = functools.partial(_focal_kernel, gamma=gamma, alpha=alpha)

    def in_map(c, i, _inner=inner):
        return (c * _inner + i, 0)

    parts = pl.pallas_call(
        kernel,
        out_shape=jax.ShapeDtypeStruct((ncores, 8, LANES), jnp.float32),
        grid_spec=pltpu.PrefetchScalarGridSpec(
            num_scalar_prefetch=0,
            grid=(ncores, inner),
            in_specs=[
                pl.BlockSpec((tr, LANES), in_map),
                pl.BlockSpec((tr, LANES), in_map),
            ],
            out_specs=pl.BlockSpec((1, 8, LANES), lambda c, i: (c, 0, 0)),
        ),
        compiler_params=pltpu.CompilerParams(
            dimension_semantics=("parallel", "arbitrary"),
        ),
    )(pred2d, true2d)

    total = jnp.sum(parts)          # tiny (ncores*8*128) final reduce in XLA
    if reduction == "mean":
        return total / jnp.float32(total_n)
    if reduction == "sum":
        return total
    # TODO(synk): reduction='none' (full elementwise tensor output) not
    # implemented; YOLOv5's FocalLoss wraps BCEWithLogitsLoss(reduction='mean').
    raise NotImplementedError(reduction)


def focal_loss_ref(pred, true, *, gamma=GAMMA, alpha=ALPHA):
    x = pred.astype(jnp.float32)
    y = true.astype(jnp.float32)
    bce = jnp.maximum(x, 0.0) - x * y + jnp.log1p(jnp.exp(-jnp.abs(x)))
    p = jax.nn.sigmoid(x)
    p_t = y * p + (1.0 - y) * (1.0 - p)
    af = y * alpha + (1.0 - y) * (1.0 - alpha)
    mf = (1.0 - p_t) ** gamma
    return jnp.mean(bce * af * mf)


if __name__ == "__main__":
    key = jax.random.PRNGKey(0)
    k1, k2 = jax.random.split(key)

    # Small shapes consistent with the module (NCHW logits + binary targets).
    B, C, H, W = 2, 4, 16, 16
    pred = jax.random.normal(k1, (B, C, H, W), dtype=jnp.float32) * 2.0
    true = (jax.random.uniform(k2, (B, C, H, W)) > 0.5).astype(jnp.float32)

    out = focal_loss(pred, true)
    out = jax.block_until_ready(out)

    ref = focal_loss_ref(pred, true)
    assert jnp.allclose(out, ref, rtol=2e-5, atol=1e-6), (out, ref)

    print("KERNEL_OK")
</pallas_src>

<mosaic_0001>
module attributes {stable_mosaic.version = 11 : i64} {
  func.func @_focal_kernel(%arg0: i32, %arg1: i32, %arg2: memref<8x128xf32, #tpu.memory_space<vmem>>, %arg3: memref<8x128xf32, #tpu.memory_space<vmem>>, %arg4: memref<1x8x128xf32, #tpu.memory_space<vmem>>) attributes {dimension_semantics = [#tpu.dimension_semantics<parallel>, #tpu.dimension_semantics<arbitrary>], iteration_bounds = array<i64: 2, 1>, scalar_prefetch = 0 : i64, scratch_operands = 0 : i64, tpu.core_type = #tpu.core_type<tc>, window_params = [{transform_indices = @transform_0, window_bounds = array<i64: 8, 128>}, {transform_indices = @transform_1, window_bounds = array<i64: 8, 128>}, {transform_indices = @transform_2, window_bounds = array<i64: 1, 8, 128>}]} {
    %c0_i32 = arith.constant 0 : i32
    %0 = arith.cmpi eq, %arg1, %c0_i32 : i32
    %1 = arith.extui %0 : i1 to i32
    %c0_i32_0 = arith.constant 0 : i32
    %2 = arith.cmpi ne, %1, %c0_i32_0 : i32
    scf.if %2 {
      %cst_22 = arith.constant 0.000000e+00 : f32
      %50 = vector.broadcast %cst_22 : f32 to vector<1x8x128xf32>
      %c0_23 = arith.constant 0 : index
      %c0_24 = arith.constant 0 : index
      %c0_25 = arith.constant 0 : index
      %51 = vector.load %arg4[%c0_23, %c0_24, %c0_25] : memref<1x8x128xf32, #tpu.memory_space<vmem>>, vector<1x8x128xf32>
      tpu.vector_store %arg4[%c0_23, %c0_24, %c0_25], %50 {strides = array<i32>} : memref<1x8x128xf32, #tpu.memory_space<vmem>>, vector<1x8x128xf32>,
    } else {
    }
    %c0 = arith.constant 0 : index
    %c0_1 = arith.constant 0 : index
    %3 = vector.load %arg2[%c0, %c0_1] : memref<8x128xf32, #tpu.memory_space<vmem>>, vector<8x128xf32>
    %c0_2 = arith.constant 0 : index
    %c0_3 = arith.constant 0 : index
    %4 = vector.load %arg3[%c0_2, %c0_3] : memref<8x128xf32, #tpu.memory_space<vmem>>, vector<8x128xf32>
    %5 = math.absf %3 : vector<8x128xf32>
    %cst = arith.constant 0.000000e+00 : f32
    %6 = vector.broadcast %cst : f32 to vector<8x128xf32>
    %7 = arith.subf %6, %5 : vector<8x128xf32>
    %8 = math.exp %7 : vector<8x128xf32>
    %cst_4 = arith.constant 0.000000e+00 : f32
    %9 = vector.broadcast %cst_4 : f32 to vector<8x128xf32>
    %10 = arith.maximumf %3, %9 : vector<8x128xf32>
    %11 = arith.mulf %3, %4 : vector<8x128xf32>
    %12 = arith.subf %10, %11 : vector<8x128xf32>
    %13 = math.log1p %8 : vector<8x128xf32>
    %14 = arith.addf %12, %13 : vector<8x128xf32>
    %cst_5 = arith.constant 1.000000e+00 : f32
    %15 = vector.broadcast %cst_5 : f32 to vector<8x128xf32>
    %16 = arith.addf %15, %8 : vector<8x128xf32>
    %cst_6 = arith.constant 1.000000e+00 : f32
    %17 = vector.broadcast %cst_6 : f32 to vector<8x128xf32>
    %18 = arith.divf %17, %16 : vector<8x128xf32>
    %cst_7 = arith.constant 0.000000e+00 : f32
    %19 = vector.broadcast %cst_7 : f32 to vector<8x128xf32>
    %20 = arith.cmpf oge, %3, %19 : vector<8x128xf32>
    %21 = arith.mulf %8, %18 : vector<8x128xf32>
    %22 = arith.select %20, %18, %21 : vector<8x128xi1>, vector<8x128xf32>
    %23 = arith.mulf %4, %22 : vector<8x128xf32>
    %cst_8 = arith.constant 1.000000e+00 : f32
    %24 = vector.broadcast %cst_8 : f32 to vector<8x128xf32>
    %25 = arith.subf %24, %4 : vector<8x128xf32>
    %cst_9 = arith.constant 1.000000e+00 : f32
    %26 = vector.broadcast %cst_9 : f32 to vector<8x128xf32>
    %27 = arith.subf %26, %22 : vector<8x128xf32>
    %28 = arith.mulf %25, %27 : vector<8x128xf32>
    %29 = arith.addf %23, %28 : vector<8x128xf32>
    %cst_10 = arith.constant 2.500000e-01 : f32
    %30 = vector.broadcast %cst_10 : f32 to vector<8x128xf32>
    %31 = arith.mulf %4, %30 : vector<8x128xf32>
    %cst_11 = arith.constant 1.000000e+00 : f32
    %32 = vector.broadcast %cst_11 : f32 to vector<8x128xf32>
    %33 = arith.subf %32, %4 : vector<8x128xf32>
    %cst_12 = arith.constant 7.500000e-01 : f32
    %34 = vector.broadcast %cst_12 : f32 to vector<8x128xf32>
    %35 = arith.mulf %33, %34 : vector<8x128xf32>
    %36 = arith.addf %31, %35 : vector<8x128xf32>
    %cst_13 = arith.constant 1.000000e+00 : f32
    %37 = vector.broadcast %cst_13 : f32 to vector<8x128xf32>
    %38 = arith.subf %37, %29 : vector<8x128xf32>
    %cst_14 = arith.constant 0.000000e+00 : f32
    %39 = vector.broadcast %cst_14 : f32 to vector<8x128xf32>
    %40 = arith.maximumf %38, %39 : vector<8x128xf32>
    %41 = math.sqrt %40 : vector<8x128xf32>
    %42 = arith.mulf %40, %41 : vector<8x128xf32>
    %43 = arith.mulf %14, %36 : vector<8x128xf32>
    %44 = arith.mulf %43, %42 : vector<8x128xf32>
    %c0_15 = arith.constant 0 : index
    %c0_16 = arith.constant 0 : index
    %c0_17 = arith.constant 0 : index
    %45 = vector.load %arg4[%c0_15, %c0_16, %c0_17] : memref<1x8x128xf32, #tpu.memory_space<vmem>>, vector<1x8x128xf32>
    %46 = vector.shape_cast %44 : vector<8x128xf32> to vector<1x1x8x128xf32>
    %cst_18 = arith.constant dense<0.000000e+00> : vector<1x8x128xf32>
    %47 = vector.multi_reduction <add>, %46, %cst_18 [1] : vector<1x1x8x128xf32> to vector<1x8x128xf32>
    %48 = arith.addf %45, %47 : vector<1x8x128xf32>
    %c0_19 = arith.constant 0 : index
    %c0_20 = arith.constant 0 : index
    %c0_21 = arith.constant 0 : index
    %49 = vector.load %arg4[%c0_19, %c0_20, %c0_21] : memref<1x8x128xf32, #tpu.memory_space<vmem>>, vector<1x8x128xf32>
    tpu.vector_store %arg4[%c0_19, %c0_20, %c0_21], %48 {strides = array<i32>} : memref<1x8x128xf32, #tpu.memory_space<vmem>>, vector<1x8x128xf32>,
    return
  }
  func.func @transform_0(%arg0: i32, %arg1: i32) -> (i32, i32) {
    %c1_i32 = arith.constant 1 : i32
    %0 = arith.muli %arg0, %c1_i32 : i32
    %1 = arith.addi %0, %arg1 : i32
    %c0_i32 = arith.constant 0 : i32
    %c0_i32_0 = arith.constant 0 : i32
    return %1, %c0_i32 : i32, i32
  }
  func.func @transform_1(%arg0: i32, %arg1: i32) -> (i32, i32) {
    %c1_i32 = arith.constant 1 : i32
    %0 = arith.muli %arg0, %c1_i32 : i32
    %1 = arith.addi %0, %arg1 : i32
    %c0_i32 = arith.constant 0 : i32
    %c0_i32_0 = arith.constant 0 : i32
    return %1, %c0_i32 : i32, i32
  }
  func.func @transform_2(%arg0: i32, %arg1: i32) -> (i32, i32, i32) {
    %c0_i32 = arith.constant 0 : i32
    %c0_i32_0 = arith.constant 0 : i32
    %c0_i32_1 = arith.constant 0 : i32
    return %arg0, %c0_i32, %c0_i32_0 : i32, i32, i32
  }
}

</mosaic_0001>

<bundles_post_ra>
// kernel: tpu_custom_call.1
= control target key start
LH: loop header
LB: loop body
LE: loop exit
PB: predicated region body
PF: predicated region fallthrough
CT: control target
= control target key end

     0   :  { %7 = vsyncpa [#allocation3], 0  ;;  %s870_s0 = inlined_call_operand.hbm [shape: f32[16,128], index: 0, kind: input, shape index: {}]   ;;  %s871_s1 = inlined_call_operand.hbm [shape: f32[16,128], index: 1, kind: input, shape index: {}]   ;;  %s872_s2 = inlined_call_operand.hbm [shape: f32[2,8,128], index: 2, kind: output, shape index: {}]  }
   0x1   :  { %9 = vsyncpa [#allocation3 + $0x1], 0 }
   0x2   :  { %10 = vsyncpa [#allocation6], 0 }
   0x3   :  { %12 = vsyncpa [#allocation6 + $0x1], 0 }
   0x4   :  { %13 = vsyncpa [#allocation4], 0 }
   0x5   :  { %15 = vsyncpa [#allocation4 + $0x1], 0  ;;  %s645_s9 = smov 0   ;;  %s647_s10 = smov 0  }
   0x6   :  { %s649_s11 = smov 0   ;;  %s651_s12 = smov 0  }
   0x7   :  { %s653_s13 = smov 0   ;;  %s655_s14 = smov 0  }
   0x8 LB: > { %s387_s15 = sadd.s32 4294967295, %s625_s14   ;;  %s388_s16 = sadd.s32 4294967294, %s625_s14   ;;  %s625_s14 = sphi %s655_s14, %s21_s14   ;;  %s621_s13 = sphi %s653_s13, %s892_s13   ;;  %s617_s12 = sphi %s651_s12, %s891_s12   ;;  %s613_s11 = sphi %s649_s11, %s890_s11   ;;  %s609_s10 = sphi %s647_s10, %s889_s10   ;;  %s605_s9 = sphi %s645_s9, %s888_s9  }
   0x9   : > { %s33_s17 = sadd.s32 1, %s621_s13  ;;  %s42_s18 = sadd.s32 1, %s613_s11 }
   0xa   : > { %p35_p0 = scmp.ge.s32.totalorder %s33_s17, 2  ;;  %p49_p1 = scmp.ne.s32.totalorder %s613_s11, %s609_s10 }
   0xb   : > { %p50_p2 = scmp.eq.s32.totalorder %s625_s14, 0  ;;  %p55_p3 = scmp.ne.s32.totalorder %s609_s10, %s605_s9 }
   0xc   : > { %s894_s17 = smov (%p35_p0, %s33_s17), 0  ;;  %p56_p5 = scmp.eq.s32.totalorder %s387_s15, 0 }
   0xd   : > { %p686_p4 = por %p50_p2, %p49_p1  ;;  %s39_s20 = ssub.s32 %s621_s13, %s894_s17 }
   0xe   : > { %p107_p6 = scmp.eq.s32.totalorder %s387_s15, 1  ;;  %p40_p7 = scmp.eq.s32.totalorder %s39_s20, 0 }
   0xf   : > { %p692_p8 = por %p56_p5, %p55_p3  ;;  %p113_p10 = scmp.eq.s32.totalorder %s388_s16, 1 }
  0x10   : > { %p696_p9 = por %p107_p6, %p49_p1  ;;  %p420_p13 = scmp.lt.s32.totalorder %s625_s14, 2 }
  0x11   : > { %s876_s21 = scalar_select %p692_p8, 1, 0 }
  0x12   : > { %s877_s22 = scalar_select %p696_p9, 1, 0 }
  0x13   : > { %s701_s23 = scalar_select %p40_p7, %s613_s11, %s42_s18  }
  0x14   : > { %p703_p11 = por %p113_p10, %p55_p3  ;;  %s710_s25 = sand.u32 1, %s613_s11  }
  0x15   : > { %s391_s26 = sshll.u32 %s710_s25, 3  ;;  %s392_s27 = sshll.u32 %s621_s13, 7 }
  0x16   : > { %s878_s24 = scalar_select %p703_p11, 1, 0 }
  0x17   : > { %s719_s30 = scalar_lea.hbm %s870_s0, %s392_s27  ;;  %s137_s3 = scalar_lea.vmem [#allocation2], %s391_s26 }
  0x18   : > { %s145_s4 = sshll.u32 %s137_s3, 4  ;;  %p727_p0 = pnand %p420_p13, %p686_p4  ;;  %s723_s4 = int_to_ptr.vmem [resolvable:$true] %s145_s4 }
  0x19   : > { %s134_s6 = scalar_lea.sflag [#allocation3], %s710_s25  ;;  %s479_s7 = scalar_lea.hbm %s719_s30, 128 }
  0x1a   : > { %p480_p3 = scmp.ne.s32.totalorder %s719_s30, %s479_s7  ;;  %p481_p5 = pneg %p727_p0 }
  0x1b   : > { %s484_s16 = scalar_lea.hbm %s870_s0, 256  ;;  %p485_p4 = scmp.lt.u32.totalorder %s719_s30, %s870_s0 }
  0x1c   : > { %p482_p6 = pnand %p481_p5, %p480_p3  ;;  %p486_p10 = scmp.lt.u32.totalorder %s484_s16, %s479_s7 }
  0x1d   : > { %p488_p12 = scmp.lt.u32.totalorder %s479_s7, %s719_s30 }
  0x1e   : > { %p483_p7 = pneg %p482_p6  ;;  %p487_p13 = por %p486_p10, %p485_p4 }
  0x20   : > { %p489_p1 = por %p488_p12, %p487_p13 }
  0x22   : > { %p490_p2 = pnand %p489_p1, %p483_p7 }
  0x24   : > { %493 = shalt.err (!%p490_p2)
}
  0x25   : > { %s494_s20 = scalar_lea.vmem %s723_s4, 128  ;;  %s627_s28 = smov [#allocation2]  }
  0x26   : > { %p495_p3 = scmp.ne.s32.totalorder %s723_s4, %s494_s20  ;;  %s499_s29 = sshll.u32 %s627_s28, 4  ;;  %s500_s29 = int_to_ptr.vmem [resolvable:$false] %s499_s29 }
  0x27   : > { %s501_s3 = scalar_lea.vmem %s500_s29, 256  ;;  %p502_p9 = scmp.lt.s32.totalorder %s723_s4, %s500_s29 }
  0x28   : > { %p497_p6 = pnand %p495_p3, %p481_p5  ;;  %p503_p4 = scmp.lt.s32.totalorder %s501_s3, %s494_s20 }
  0x2a   : > { %p498_p11 = pneg %p497_p6  ;;  %p504_p10 = por %p503_p4, %p502_p9 }
  0x2c   : > { %p505_p12 = pnand %p504_p10, %p498_p11 }
  0x2e   : > { %508 = shalt.err (!%p505_p12)
}
  0x2f   : > { %412 = dma.hbm_to_vmem [thread:$0]  (!%p727_p0), %s719_s30, 128, %s723_s4, %s134_s6  }
  0x30   : > { %p880_p1 = scmp.lt.s32.totalorder %s625_s14, 3  ;;  %p881_p2 = scmp.ge.s32.totalorder %s625_s14, 1 }
  0x31   : > { %s772_s16 = scalar_lea.hbm %s871_s1, %s392_s27  ;;  %s156_s18 = scalar_lea.vmem [#allocation5], %s391_s26 }
  0x32   : > { %p763_p7 = pnand %p881_p2, %p880_p1  ;;  %s164_s19 = sshll.u32 %s156_s18, 4  ;;  %s165_s19 = int_to_ptr.vmem [resolvable:$true] %s164_s19 }
  0x33   : > { %s153_s30 = scalar_lea.sflag [#allocation6], %s710_s25  ;;  %s509_s4 = scalar_lea.hbm %s772_s16, 128 }
  0x34   : > { %s882_s7 = scalar_select %p763_p7, 1, 0 }
  0x35   : > { %p510_p9 = scmp.ne.s32.totalorder %s772_s16, %s509_s4  ;;  %s514_s27 = scalar_lea.hbm %s871_s1, 256 }
  0x36   : > { %p515_p3 = scmp.lt.u32.totalorder %s772_s16, %s871_s1  ;;  %p516_p6 = scmp.lt.u32.totalorder %s514_s27, %s509_s4 }
  0x37   : > { %p512_p11 = pnand %p510_p9, %p481_p5  ;;  %p518_p10 = scmp.lt.u32.totalorder %s509_s4, %s772_s16 }
  0x38   : > { %p517_p4 = por %p516_p6, %p515_p3 }
  0x39   : > { %p513_p13 = pneg %p512_p11 }
  0x3a   : > { %p519_p12 = por %p518_p10, %p517_p4 }
  0x3c   : > { %p520_p1 = pnand %p519_p12, %p513_p13 }
  0x3e   : > { %523 = shalt.err (!%p520_p1)
}
  0x3f   : > { %s524_s25 = scalar_lea.vmem %s165_s19, 128  ;;  %s628_s26 = smov [#allocation5]  }
  0x40   : > { %p525_p2 = scmp.ne.s32.totalorder %s165_s19, %s524_s25  ;;  %s529_s3 = sshll.u32 %s628_s26, 4  ;;  %s530_s3 = int_to_ptr.vmem [resolvable:$false] %s529_s3 }
  0x41   : > { %s531_s8 = scalar_lea.vmem %s530_s3, 256  ;;  %p532_p8 = scmp.lt.s32.totalorder %s165_s19, %s530_s3 }
  0x42   : > { %p527_p9 = pnand %p525_p2, %p481_p5  ;;  %p533_p7 = scmp.lt.s32.totalorder %s531_s8, %s524_s25 }
  0x44   : > { %p528_p11 = pneg %p527_p9  ;;  %p534_p3 = por %p533_p7, %p532_p8 }
  0x46   : > { %p535_p6 = pnand %p534_p3, %p528_p11 }
  0x48   : > { %538 = shalt.err (!%p535_p6)
}
  0x49   : > { %415 = dma.hbm_to_vmem [thread:$0]  (!%p727_p0), %s772_s16, 128, %s165_s19, %s153_s30  }
  0x4a   : > { %p883_p13 = scmp.ne.s32.totalorder %s882_s7, 0 }
  0x4b   : > { %s799_s15 = sand.u32 (!%p883_p13), 1, %s609_s10   ;;  %p884_p8 = scmp.ne.s32.totalorder (!%p883_p13), %s876_s21, 0 }
  0x4c   : > { %173 = sbr.rel (%p883_p13) target bundleno = 163 (0xa3), region = 28  ;;  %s802_s18 = sshll.u32 (!%p883_p13), %s799_s15, 3 }
  0x4d   : > { %s176_s4 = scalar_lea.sflag (!%p883_p13), [#allocation3], %s799_s15  ;;  %s179_s6 = scalar_lea.vmem (!%p883_p13), [#allocation2], %s802_s18 }
  0x53   : > { %592 = dma.done.wait (%p884_p8), %s176_s4, 128  }
  0x54   : > { %594 = vsyncadd (%p884_p8), %s176_s4, 4294967168  ;;  %s185_s5 = scalar_lea.sflag [#allocation6], %s799_s15  ;;  %s188_s7 = scalar_lea.vmem [#allocation5], %s802_s18 }
  0x55   : > { %596 = dma.done.wait (%p884_p8), %s185_s5, 128  }
  0x56   : > { %598 = vsyncadd (%p884_p8), %s185_s5, 4294967168  ;;  %v221_v0 = vld [vmem:[%s179_s6] sm:$0xff]  ;;  %v222_v6 = vld [vmem:[%s188_s7] sm:$0xff]  ;;  %s400_s21 = sshll.u32 %s617_s12, 7  ;;  %s213_s16 = scalar_lea.vmem [#allocation7], %s802_s18 }
  0x57   : > { %v223_v1 = vand.u32 2147483647, %v221_v0  ;;  %vm243_vm0 = vcmp.ge.f32.partialorder %v221_v0, 0.0  ;;  %v247_v9 = vsub.f32 1.0, %v222_v6  ;;  %v227_v21 = vmax.f32 %v221_v0, 0.0  ;;  %s284_s19 = sshll.u32 %s213_s16, 4  ;;  %s821_s27 = scalar_lea.hbm %s872_s2, %s400_s21  ;;  %s823_s19 = int_to_ptr.vmem [resolvable:$true] %s284_s19 }
  0x58   : > { %v228_v22 = vmul.f32 %v222_v6, %v221_v0  ;;  %v251_v26 = vmul.f32 0.25, %v222_v6  ;;  %s271_s28 = scalar_lea.sflag [#allocation4], %s799_s15  ;;  %s539_s29 = scalar_lea.vmem %s823_s19, 128 }
  0x59   : > { %v224_v2 = vsub.f32 0.0, %v223_v1  ;;  %v252_v27 = vmul.f32 0.75, %v247_v9  ;;  %p540_p0 = scmp.ne.s32.totalorder %s823_s19, %s539_s29  ;;  %p885_p5 = scmp.ne.s32.totalorder %s877_s22, 0 }
  0x5a   : > { %v229_v25 = vsub.f32 %v227_v21, %v228_v22  ;;  %s629_s12 = smov [#allocation7]  }
  0x5b   : > { %v225_v3 = vmul.f32 1.442695, %v224_v2  ;;  %v253_v30 = vadd.f32 %v252_v27, %v251_v26  ;;  %p541_p7 = pnand %p540_p0, %p885_p5  ;;  %s543_s25 = sshll.u32 %s629_s12, 4  ;;  %s544_s25 = int_to_ptr.vmem [resolvable:$false] %s543_s25 }
  0x5c   : > { %s545_s26 = scalar_lea.vmem %s544_s25, 256  ;;  %p546_p10 = scmp.lt.s32.totalorder %s823_s19, %s544_s25 }
  0x5d   : > { %471 = vpow2.f32 %v225_v3  ;;  %p542_p4 = pneg %p541_p7  ;;  %p547_p12 = scmp.lt.s32.totalorder %s545_s26, %s539_s29 }
  0x5f   : > { %p548_p1 = por %p547_p12, %p546_p10 }
  0x61   : > { %p549_p2 = pnand %p548_p1, %p542_p4 }
  0x67   : > { %v472_v4 = vpop.eup %471 }
  0x68   : > { %v230_v5 = vadd.f32 1.0, %v472_v4  ;;  %v233_v14 = vmul.f32 -0.5, %v472_v4  ;;  %v236_v20 = vand.u32 2147483647, %v472_v4 }
  0x6a   : > { %473 = vrcp.f32 %v230_v5  ;;  %v234_v17 = vadd.f32 1.0, %v233_v14  ;;  %vm237_vm1 = vcmp.lt.f32.partialorder %v236_v20, 0.0004427343 }
  0x6b   : > { %475 = vlog2.f32 %v230_v5 }
  0x6c   : > { %v235_v24 = vmul.f32 %v472_v4, %v234_v17 }
  0x74   : > { %v474_v7 = vpop.eup %473 }
  0x75   : > { %v244_v8 = vmul.f32 %v474_v7, %v472_v4  ;;  %v476_v19 = vpop.eup %475 }
  0x76   : > { %v232_v23 = vmul.f32 0.6931472, %v476_v19 }
  0x77   : > { %v245_v10 = vsel %vm243_vm0, %v474_v7, %v244_v8 }
  0x78   : > { %v246_v11 = vmul.f32 %v245_v10, %v222_v6  ;;  %v248_v12 = vsub.f32 1.0, %v245_v10  ;;  %v238_v28 = vsel %vm237_vm1, %v235_v24, %v232_v23 }
  0x79   : > { %v239_v29 = vadd.f32 %v238_v28, %v229_v25 }
  0x7a   : > { %v249_v13 = vmul.f32 %v248_v12, %v247_v9 }
  0x7b   : > { %v264_v35 = vmul.f32 %v253_v30, %v239_v29 }
  0x7c   : > { %v250_v15 = vadd.f32 %v249_v13, %v246_v11 }
  0x7e   : > { %v254_v16 = vsub.f32 1.0, %v250_v15 }
  0x80   : > { %v255_v18 = vmax.f32 %v254_v16, 0.0 }
  0x82   : > { %477 = vrsqrt.f32 %v255_v18  ;;  %vm258_vm2 = vcmp.eq.f32.partialorder %v255_v18, inf  ;;  %v261_v32 = vand.u32 2147483648, %v255_v18  ;;  %vm260_vm3 = vcmp.eq.f32.partialorder %v255_v18, 0.0 }
  0x8c   : > { %v478_v31 = vpop.eup %477 }
  0x8d   : > { %v257_v33 = vmul.f32 %v478_v31, %v255_v18 }
  0x8f   : > { %v259_v34 = vsel %vm258_vm2, %v255_v18, %v257_v33 }
  0x90   : > { %v262_v36 = vsel %vm260_vm3, %v261_v32, %v259_v34 }
  0x91   : > { %v263_v37 = vmul.f32 %v262_v36, %v255_v18 }
  0x93   : > { %v265_v38 = vmul.f32 %v264_v35, %v263_v37 }
  0x95   : > { %269 = vst [vmem:[%s213_s16] sm:$0xff] %v265_v38 }
  0x96   : > { %552 = shalt.err (!%p549_p2)
}
  0x97   : > { %s553_s3 = scalar_lea.hbm %s821_s27, 128  ;;  %s557_s18 = scalar_lea.hbm %s872_s2, 256 }
  0x98   : > { %p554_p9 = scmp.ne.s32.totalorder %s821_s27, %s553_s3  ;;  %p558_p6 = scmp.lt.u32.totalorder %s821_s27, %s872_s2 }
  0x99   : > { %p559_p13 = scmp.lt.u32.totalorder %s557_s18, %s553_s3  ;;  %p561_p0 = scmp.lt.u32.totalorder %s553_s3, %s821_s27 }
  0x9a   : > { %p555_p11 = pnand %p554_p9, %p885_p5 }
  0x9b   : > { %p560_p8 = por %p559_p13, %p558_p6 }
  0x9c   : > { %p556_p3 = pneg %p555_p11 }
  0x9d   : > { %p562_p7 = por %p561_p0, %p560_p8 }
  0x9f   : > { %p563_p4 = pnand %p562_p7, %p556_p3 }
  0xa1   : > { %566 = shalt.err (!%p563_p4)
}
  0xa2   : > { %407 = dma.vmem_to_hbm [thread:$0]  (%p885_p5), %s823_s19, 128, %s821_s27, %s271_s28  }
  0xa3 PF: > { %s296_s5 = sand.u32 1, %s605_s9   ;;  %p886_p10 = scmp.ne.s32.totalorder %s878_s24, 0 }
  0xa4   : > { %p887_p12 = scmp.ge.s32.totalorder %s625_s14, 2  ;;  %s297_s7 = scalar_lea.sflag [#allocation4], %s296_s5 }
  0xa6   : > { %p417_p1 = pnand %p887_p12, %p886_p10 }
  0xa8   : > { %600 = dma.done.wait (!%p417_p1), %s297_s7, 128  }
  0xa9   : > { %602 = vsyncadd (!%p417_p1), %s297_s7, 4294967168  ;;  %s21_s14 = sadd.s32 1, %s625_s14   ;;  %s888_s9 = smov %s609_s10 }
  0xaa   : > { %p18_p2 = scmp.ge.s32.totalorder %s21_s14, 4   ;;  %s889_s10 = smov %s613_s11 }
  0xab   : > { %s890_s11 = smov %s701_s23  ;;  %s891_s12 = smov %s621_s13 }
  0xac   : > { %s892_s13 = smov %s894_s17  ;;  %20 = sbr.rel (!%p18_p2) target bundleno = 8 (0x8), region = 90 }
  0xb3   :  { %302 = vsyncpa [#allocation3], 1 }
  0xb4   :  { %304 = vsyncpa [#allocation3 + $0x1], 1 }
  0xb5   :  { %305 = vsyncpa [#allocation6], 1 }
  0xb6   :  { %307 = vsyncpa [#allocation6 + $0x1], 1 }
  0xb7   :  { %308 = vsyncpa [#allocation4], 1 }
  0xb8   :  { %310 = vsyncpa [#allocation4 + $0x1], 1 }

</bundles_post_ra>
